<compile_context>
chip_gen: v5e
topology: v5e:2x2
jax: 0.10.0
libtpu: 0.0.40
codegen_flags: <defaults>
</compile_context>

<pallas_src>
import jax
import jax.numpy as jnp
from jax.experimental import pallas as pl
from jax.experimental.pallas import tpu as pltpu

_LANE = 128   # lane width: last-dim store granularity
_SUB = 8      # sublane group: second-to-last-dim granularity


def _mlp_kernel(x_ref, w1_ref, b1_ref, w2_ref, b2_ref, o_ref):
    # Two MXU matmuls + VPU bias-add / ReLU, all on one VMEM-resident tile.
    x = x_ref[...]                                         # (TB, D)
    h = jnp.dot(x, w1_ref[...],
                preferred_element_type=jnp.float32)        # (TB, H)  f32 acc
    h = jnp.maximum(h + b1_ref[...], 0.0)                  # bias + ReLU (f32)
    # Dropout(0.2): identity in eval mode.
    y = jnp.dot(h.astype(w2_ref.dtype), w2_ref[...],
                preferred_element_type=jnp.float32)        # (TB, Ep) f32 acc
    y = jnp.maximum(y + b2_ref[...], 0.0)                  # bias + ReLU (f32)
    o_ref[...] = y.astype(o_ref.dtype)                     # lane-dense store


def _round_up(n, m):
    return ((n + m - 1) // m) * m


def metadata_encoder_forward(x, w1, b1, w2, b2, *, batch_tile=512):
    """relu(dropout_eval(relu(x @ w1 + b1)) @ w2 + b2) via one pallas_call.

    x:  (B, D) f32
    w1: (D, H),  b1: (1, H)
    w2: (H, E),  b2: (1, E)
    """
    B, D = x.shape
    H = w1.shape[1]
    E = w2.shape[1]

    # --- Lane-dense output: pad out_features up to a multiple of 128. -------
    Ep = _round_up(E, _LANE)
    if Ep != E:
        w2p = jnp.zeros((H, Ep), w2.dtype).at[:, :E].set(w2)
        b2p = jnp.zeros((1, Ep), b2.dtype).at[:, :E].set(b2)
    else:
        w2p, b2p = w2, b2

    # --- Batch: pad to a full sublane group; tile over a grid if B is large. -
    TB = _round_up(min(batch_tile, _round_up(B, _SUB)), _SUB)
    Bp = _round_up(B, TB)
    xp = x if Bp == B else jnp.zeros((Bp, D), x.dtype).at[:B, :].set(x)

    grid = (Bp // TB,)

    itemsz = lambda a: a.size * a.dtype.itemsize
    cost = pl.CostEstimate(
        flops=2 * Bp * (D * H + H * Ep),
        transcendentals=0,
        bytes_accessed=(itemsz(xp) + itemsz(w1) + itemsz(b1)
                        + itemsz(w2p) + itemsz(b2p) + Bp * Ep * 4),
    )

    out = pl.pallas_call(
        _mlp_kernel,
        out_shape=jax.ShapeDtypeStruct((Bp, Ep), jnp.float32),
        grid=grid,
        in_specs=[
            pl.BlockSpec((TB, D), lambda i: (i, 0)),   # x: tiled over batch
            pl.BlockSpec((D, H), lambda i: (0, 0)),    # weights: VMEM-resident,
            pl.BlockSpec((1, H), lambda i: (0, 0)),    # constant index_map →
            pl.BlockSpec((H, Ep), lambda i: (0, 0)),   # DMA'd once
            pl.BlockSpec((1, Ep), lambda i: (0, 0)),
        ],
        out_specs=pl.BlockSpec((TB, Ep), lambda i: (i, 0)),
        compiler_params=pltpu.CompilerParams(
            dimension_semantics=("parallel",)),        # shard grid across TCs
        cost_estimate=cost,
    )(xp, w1, b1, w2p, b2p)

    # Strip batch/lane padding.
    return out[:B, :E]


def init_params(key, metadata_dims, embedding_dim=32, hidden=128,
                dtype=jnp.float32):
    """Deterministic init matching nn.Linear shapes (stored transposed:
    [in, out] instead of PyTorch's [out, in])."""
    k1, k2, k3, k4 = jax.random.split(key, 4)
    lim1 = 1.0 / jnp.sqrt(metadata_dims)
    lim2 = 1.0 / jnp.sqrt(hidden)
    w1 = jax.random.uniform(k1, (metadata_dims, hidden), jnp.float32, -lim1, lim1)
    b1 = jax.random.uniform(k2, (1, hidden), jnp.float32, -lim1, lim1)
    w2 = jax.random.uniform(k3, (hidden, embedding_dim), jnp.float32, -lim2, lim2)
    b2 = jax.random.uniform(k4, (1, embedding_dim), jnp.float32, -lim2, lim2)
    return w1.astype(dtype), b1, w2.astype(dtype), b2


if __name__ == "__main__":
    metadata_dims = 16
    embedding_dim = 32
    batch = 2

    key = jax.random.PRNGKey(0)
    k_x, k_p = jax.random.split(key)
    x = jax.random.normal(k_x, (batch, metadata_dims), dtype=jnp.float32)
    w1, b1, w2, b2 = init_params(k_p, metadata_dims, embedding_dim)

    out = metadata_encoder_forward(x, w1, b1, w2, b2)
    out = jax.block_until_ready(out)

    # Reference in plain JAX (dropout in eval mode = identity).
    ref = jnp.maximum(jnp.maximum(x @ w1 + b1, 0.0) @ w2 + b2, 0.0)
    assert out.shape == (batch, embedding_dim)
    assert jnp.allclose(out, ref, atol=1e-5, rtol=1e-5)

    print("KERNEL_OK")
</pallas_src>

<mosaic_0001>
module attributes {stable_mosaic.version = 11 : i64} {
  func.func @_mlp_kernel(%arg0: i32, %arg1: memref<8x16xf32, #tpu.memory_space<vmem>>, %arg2: memref<16x128xf32, #tpu.memory_space<vmem>>, %arg3: memref<1x128xf32, #tpu.memory_space<vmem>>, %arg4: memref<128x128xf32, #tpu.memory_space<vmem>>, %arg5: memref<1x128xf32, #tpu.memory_space<vmem>>, %arg6: memref<8x128xf32, #tpu.memory_space<vmem>>) attributes {dimension_semantics = [#tpu.dimension_semantics<parallel>], iteration_bounds = array<i64: 1>, scalar_prefetch = 0 : i64, scratch_operands = 0 : i64, tpu.core_type = #tpu.core_type<tc>, window_params = [{transform_indices = @transform_0, window_bounds = array<i64: 8, 16>}, {pipeline_mode = #tpu.pipeline_mode<synchronous>, transform_indices = @transform_1, window_bounds = array<i64: 16, 128>}, {pipeline_mode = #tpu.pipeline_mode<synchronous>, transform_indices = @transform_2, window_bounds = array<i64: 1, 128>}, {pipeline_mode = #tpu.pipeline_mode<synchronous>, transform_indices = @transform_3, window_bounds = array<i64: 128, 128>}, {pipeline_mode = #tpu.pipeline_mode<synchronous>, transform_indices = @transform_4, window_bounds = array<i64: 1, 128>}, {transform_indices = @transform_5, window_bounds = array<i64: 8, 128>}]} {
    %c0 = arith.constant 0 : index
    %c0_0 = arith.constant 0 : index
    %0 = vector.load %arg1[%c0, %c0_0] : memref<8x16xf32, #tpu.memory_space<vmem>>, vector<8x16xf32>
    %c0_1 = arith.constant 0 : index
    %c0_2 = arith.constant 0 : index
    %1 = vector.load %arg2[%c0_1, %c0_2] : memref<16x128xf32, #tpu.memory_space<vmem>>, vector<16x128xf32>
    %cst = arith.constant dense<0.000000e+00> : vector<8x128xf32>
    %2 = tpu.matmul %0, %1, %cst {dimension_numbers = #tpu.dot_dimension_numbers<[1], [0], [0], [1], [0, 0, 1, 1], [], []>} : vector<8x16xf32>, vector<16x128xf32>, vector<8x128xf32> -> vector<8x128xf32>
    %c0_3 = arith.constant 0 : index
    %c0_4 = arith.constant 0 : index
    %3 = vector.load %arg3[%c0_3, %c0_4] : memref<1x128xf32, #tpu.memory_space<vmem>>, vector<1x128xf32>
    %4 = vector.broadcast %3 : vector<1x128xf32> to vector<8x128xf32>
    %5 = arith.addf %2, %4 : vector<8x128xf32>
    %cst_5 = arith.constant 0.000000e+00 : f32
    %6 = vector.broadcast %cst_5 : f32 to vector<8x128xf32>
    %7 = arith.maximumf %5, %6 : vector<8x128xf32>
    %c0_6 = arith.constant 0 : index
    %c0_7 = arith.constant 0 : index
    %8 = vector.load %arg4[%c0_6, %c0_7] : memref<128x128xf32, #tpu.memory_space<vmem>>, vector<128x128xf32>
    %cst_8 = arith.constant dense<0.000000e+00> : vector<8x128xf32>
    %9 = tpu.matmul %7, %8, %cst_8 {dimension_numbers = #tpu.dot_dimension_numbers<[1], [0], [0], [1], [0, 0, 1, 1], [], []>} : vector<8x128xf32>, vector<128x128xf32>, vector<8x128xf32> -> vector<8x128xf32>
    %c0_9 = arith.constant 0 : index
    %c0_10 = arith.constant 0 : index
    %10 = vector.load %arg5[%c0_9, %c0_10] : memref<1x128xf32, #tpu.memory_space<vmem>>, vector<1x128xf32>
    %11 = vector.broadcast %10 : vector<1x128xf32> to vector<8x128xf32>
    %12 = arith.addf %9, %11 : vector<8x128xf32>
    %cst_11 = arith.constant 0.000000e+00 : f32
    %13 = vector.broadcast %cst_11 : f32 to vector<8x128xf32>
    %14 = arith.maximumf %12, %13 : vector<8x128xf32>
    %c0_12 = arith.constant 0 : index
    %c0_13 = arith.constant 0 : index
    %15 = vector.load %arg6[%c0_12, %c0_13] : memref<8x128xf32, #tpu.memory_space<vmem>>, vector<8x128xf32>
    tpu.vector_store %arg6[%c0_12, %c0_13], %14 {strides = array<i32>} : memref<8x128xf32, #tpu.memory_space<vmem>>, vector<8x128xf32>,
    return
  }
  func.func @transform_0(%arg0: i32) -> (i32, i32) {
    %c0_i32 = arith.constant 0 : i32
    %c0_i32_0 = arith.constant 0 : i32
    return %arg0, %c0_i32 : i32, i32
  }
  func.func @transform_1(%arg0: i32) -> (i32, i32) {
    %c0_i32 = arith.constant 0 : i32
    %c0_i32_0 = arith.constant 0 : i32
    %c0_i32_1 = arith.constant 0 : i32
    return %c0_i32, %c0_i32_0 : i32, i32
  }
  func.func @transform_2(%arg0: i32) -> (i32, i32) {
    %c0_i32 = arith.constant 0 : i32
    %c0_i32_0 = arith.constant 0 : i32
    %c0_i32_1 = arith.constant 0 : i32
    return %c0_i32, %c0_i32_0 : i32, i32
  }
  func.func @transform_3(%arg0: i32) -> (i32, i32) {
    %c0_i32 = arith.constant 0 : i32
    %c0_i32_0 = arith.constant 0 : i32
    %c0_i32_1 = arith.constant 0 : i32
    return %c0_i32, %c0_i32_0 : i32, i32
  }
  func.func @transform_4(%arg0: i32) -> (i32, i32) {
    %c0_i32 = arith.constant 0 : i32
    %c0_i32_0 = arith.constant 0 : i32
    %c0_i32_1 = arith.constant 0 : i32
    return %c0_i32, %c0_i32_0 : i32, i32
  }
  func.func @transform_5(%arg0: i32) -> (i32, i32) {
    %c0_i32 = arith.constant 0 : i32
    %c0_i32_0 = arith.constant 0 : i32
    return %arg0, %c0_i32 : i32, i32
  }
}

</mosaic_0001>

<bundles_post_ra>
// kernel: tpu_custom_call.1
= control target key start
LH: loop header
LB: loop body
LE: loop exit
PB: predicated region body
PF: predicated region fallthrough
CT: control target
= control target key end

     0   :  { %10 = vsyncpa [#allocation3], 0  ;;  %s323_s0 = inlined_call_operand.hbm [shape: f32[8,16], index: 0, kind: input, shape index: {}]   ;;  %s324_s1 = inlined_call_operand.hbm [shape: f32[16,128], index: 1, kind: input, shape index: {}]   ;;  %s325_s2 = inlined_call_operand.vmem [shape: f32[1,128], index: 2, kind: input, shape index: {}]   ;;  %s326_s3 = inlined_call_operand.hbm [shape: f32[128,128], index: 3, kind: input, shape index: {}]   ;;  %s327_s4 = inlined_call_operand.vmem [shape: f32[1,128], index: 4, kind: input, shape index: {}]   ;;  %s328_s5 = inlined_call_operand.hbm [shape: f32[8,128], index: 5, kind: output, shape index: {}]  }
   0x1   :  { %11 = vsyncpa [#allocation6], 0  ;;  %s28_s20 = sshll.u32 %s324_s1, 4  ;;  %s29_s20 = int_to_ptr.hbm [resolvable:$true] %s28_s20 }
   0x2   :  { %12 = vsyncpa [#allocation4], 0  ;;  %s269_s21 = smov [#allocation5]   ;;  %s18_s25 = sshll.u32 %s323_s0, 4  ;;  %s19_s25 = int_to_ptr.hbm [resolvable:$true] %s18_s25 }
   0x3   :  { %s30_s22 = sshll.u32 %s269_s21, 4  ;;  %s270_s26 = smov 128   ;;  %s31_s22 = int_to_ptr.vmem [resolvable:$true] %s30_s22 }
   0x4   :  { %s271_s27 = smov 8   ;;  %s272_s28 = smov [#allocation2]  }
   0x5   :  { %36 = dma.hbm_to_vmem [thread:$0]  %s29_s20, 256, %s31_s22, [#allocation6], %s270_s26, %s270_s26, %s271_s27  }
   0x6   :  { %s20_s29 = sshll.u32 %s272_s28, 4  ;;  %s43_s7 = sshll.u32 %s326_s3, 4  ;;  %s21_s29 = int_to_ptr.vmem [resolvable:$true] %s20_s29  ;;  %s44_s7 = int_to_ptr.hbm [resolvable:$true] %s43_s7 }
   0x7   :  { %23 = dma.hbm_to_vmem [thread:$0]  %s19_s25, 128, %s21_s29, [#allocation3]  }
   0x8   :  { %s273_s1 = smov [#allocation7]  }
   0x9   :  { %s45_s8 = sshll.u32 %s273_s1, 4  ;;  %s46_s8 = int_to_ptr.vmem [resolvable:$true] %s45_s8 }
   0xa   :  { %51 = dma.hbm_to_vmem [thread:$0]  %s44_s7, 2048, %s46_s8, [#allocation6], %s270_s26, %s270_s26, %s271_s27  }
   0xb   :  { %263 = dma.done.wait [#allocation3], 128  }
   0xc   :  { %264 = vsyncadd [#allocation3], 4294967168 }
   0xd   :  { %265 = dma.done.wait [#allocation6], 2304  }
   0xe   :  { %266 = vsyncadd [#allocation6], 4294964992  ;;  %v68_v0 = vld [vmem:[#allocation5 + $0x8] sm:$0xff]  ;;  %v67_v1 = vld [vmem:[#allocation5] sm:$0xff]  ;;  %vm73_vm0 = vcmask 130048   ;;  %s274_s11 = smov [#allocation8]  }
   0xf   :  { %91 = vmatpush.msra.mxu0 %v68_v0  ;;  %v66_v2 = vld [vmem:[#allocation2] sm:$0xff]  ;;  %v113_v3 = vld [vmem:[#allocation7 + $0x78] sm:$0xff]  ;;  %v112_v4 = vld [vmem:[#allocation7 + $0x70] sm:$0xff]  ;;  %s145_s12 = sshll.u32 %s274_s11, 4  ;;  %s147_s15 = sshll.u32 %s328_s5, 4  ;;  %s146_s12 = int_to_ptr.vmem [resolvable:$true] %s145_s12  ;;  %s148_s15 = int_to_ptr.hbm [resolvable:$true] %s147_s15 }
  0x10   :  { %118 = vmatpush.msra.mxu1 %v113_v3  ;;  %v111_v5 = vld [vmem:[#allocation7 + $0x68] sm:$0xff]  ;;  %v110_v6 = vld [vmem:[#allocation7 + $0x60] sm:$0xff]  ;;  %v109_v7 = vld [vmem:[#allocation7 + $0x58] sm:$0xff] }
  0x11   :  { %92 = vmatpush.msra.mxu0 %v67_v1  ;;  %v108_v8 = vld [vmem:[#allocation7 + $0x50] sm:$0xff]  ;;  %v107_v9 = vld [vmem:[#allocation7 + $0x48] sm:$0xff]  ;;  %v106_v10 = vld [vmem:[#allocation7 + $0x40] sm:$0xff] }
  0x12   :  { %158 = vmatmul.msk.f32.vlgmr.msra.gmra.mxu0 %vm73_vm0, %v66_v2  ;;  %119 = vmatpush.msra.mxu1 %v112_v4  ;;  %v105_v11 = vld [vmem:[#allocation7 + $0x38] sm:$0xff]  ;;  %v104_v12 = vld [vmem:[#allocation7 + $0x30] sm:$0xff]  ;;  %v103_v13 = vld [vmem:[#allocation7 + $0x28] sm:$0xff] }
  0x13   :  { %v102_v14 = vld [vmem:[#allocation7 + $0x20] sm:$0xff]  ;;  %v101_v15 = vld [vmem:[#allocation7 + $0x18] sm:$0xff]  ;;  %v100_v16 = vld [vmem:[#allocation7 + $0x10] sm:$0xff] }
  0x14   :  { %120 = vmatpush.msra.mxu1 %v111_v5  ;;  %v99_v17 = vld [vmem:[#allocation7 + $0x8] sm:$0xff]  ;;  %v98_v18 = vld [vmem:[#allocation7] sm:$0xff] }
  0x15   :  { %v165_v19 = vld [vmem:[%s325_s2] ss:$0 sm:$0xff] }
  0x16   :  { %121 = vmatpush.msra.mxu1 %v110_v6  ;;  %v166_v23 = vld [vmem:[%s327_s4] ss:$0 sm:$0xff] }
  0x18   :  { %122 = vmatpush.msra.mxu1 %v109_v7 }
  0x1a   :  { %123 = vmatpush.msra.mxu1 %v108_v8 }
  0x1c   :  { %124 = vmatpush.msra.mxu1 %v107_v9 }
  0x1e   :  { %125 = vmatpush.msra.mxu1 %v106_v10 }
  0x20   :  { %126 = vmatpush.msra.mxu1 %v105_v11 }
  0x22   :  { %127 = vmatpush.msra.mxu1 %v104_v12 }
  0x24   :  { %128 = vmatpush.msra.mxu1 %v103_v13 }
  0x26   :  { %129 = vmatpush.msra.mxu1 %v102_v14 }
  0x28   :  { %130 = vmatpush.msra.mxu1 %v101_v15 }
  0x2a   :  { %131 = vmatpush.msra.mxu1 %v100_v16 }
  0x2c   :  { %132 = vmatpush.msra.mxu1 %v99_v17 }
  0x2e   :  { %133 = vmatpush.msra.mxu1 %v98_v18 }
  0x8f   :  { %v94_v20 = vpop.f32.mrf.mxu0 }
  0x90   :  { %v95_v21 = vadd.f32 %v165_v19, %v94_v20 }
  0x92   :  { %v97_v22 = vmax.f32 %v95_v21, 0.0 }
  0x94   :  { %134 = vmatmul.f32.vlgmr.msra.gmra.mxu1 %v97_v22 }
 0x111   :  { %v135_v24 = vpop.f32.mrf.mxu1 }
 0x112   :  { %v136_v25 = vadd.f32 %v166_v23, %v135_v24 }
 0x114   :  { %v138_v26 = vmax.f32 %v136_v25, 0.0 }
 0x116   :  { %139 = vst [vmem:[#allocation8] sm:$0xff] %v138_v26 }
 0x117   :  { %150 = dma.vmem_to_hbm [thread:$0]  %s146_s12, 128, %s148_s15, [#allocation4]  }
 0x118   :  { %267 = dma.done.wait [#allocation4], 128  }
 0x119   :  { %268 = vsyncadd [#allocation4], 4294967168 }
 0x11a   :  { %155 = vsyncpa [#allocation3], 1 }
 0x11b   :  { %156 = vsyncpa [#allocation6], 1 }
 0x11c   :  { %157 = vsyncpa [#allocation4], 1 }

</bundles_post_ra>
